<compile_context>
chip_gen: v7x
topology: tpu7x:2x2x1
jax: 0.10.0
libtpu: 0.0.40
codegen_flags: <defaults>
</compile_context>

<pallas_src>
import functools

import jax
import jax.numpy as jnp
from jax.experimental import pallas as pl
from jax.experimental.pallas import tpu as pltpu


def _quanconv_kernel(x_ref, a_ref, b_ref, s_ref, g_ref, ps_ref, o_ref, *,
                     H, P, KH, TH, th_in, qmin, qmax):
    """One grid step = one (batch image, block of TH output rows).  stride == 1.

    x_ref : (Hp, Wp*C)  f32   zero-padded input image, lane-dense ((W, C) folded)
    a_ref : (1, Wp*C)   f32   BN scale  gamma/sqrt(var+eps), zeroed on pad columns
    b_ref : (1, Wp*C)   f32   BN shift  beta - mean*a,       zeroed on pad columns
    s_ref : (1,)  SMEM  f32   activation quantizer scale
    g_ref : (KH, Wp*C, Wo*O)  bf16  block-Toeplitz sign-weight matrices
    ps_ref: (1, Wo*O)   f32   per-(ow, o) post-scale = alpha[o] / scale
    o_ref : (TH, Wo*O)  f32   packed, lane-dense output row-block
    """
    i = pl.program_id(1)
    r0 = pl.multiple_of(i * TH, TH)              # first padded input row of this block

    x = x_ref[pl.ds(r0, th_in), :]               # (th_in, Wp*C), lane-dense

    # Fused BatchNorm affine + symmetric 8-bit fake-quant (integer codes, f32).
    # Column zero-padding is already folded into a/b (both 0 there -> code 0).
    y = x * a_ref[...] + b_ref[...]
    q = jnp.clip(jnp.round(y * s_ref[0]), qmin, qmax)

    # Top/bottom zero-pad rows: raw zeros map to `b` under BN, so re-zero them.
    # Only a (th_in, 1) row mask is needed; the column mask is static (in a/b).
    row = jax.lax.broadcasted_iota(jnp.int32, (th_in, 1), 0) + r0
    q = jnp.where((row >= P) & (row < H + P), q, 0.0)

    qb = q.astype(jnp.bfloat16)                  # integer codes in [-128,127]: exact in bf16

    # Conv as KH block-Toeplitz matmuls: each dot contracts the whole (kw, c)
    # extent in one pass (K = Wp*C) and lands directly in the packed (TH, Wo*O)
    # output layout.  Integer products accumulate exactly in f32.
    acc = jnp.dot(qb[0:TH, :], g_ref[0], preferred_element_type=jnp.float32)
    for dh in range(1, KH):
        acc = acc + jnp.dot(qb[dh:dh + TH, :], g_ref[dh],
                            preferred_element_type=jnp.float32)

    # Fused epilogue: per-out-channel alpha/scale post-scale + ReLU, lane-dense store.
    o_ref[...] = jnp.maximum(acc * ps_ref[...], 0.0).astype(o_ref.dtype)


def _pick_block_rows(Ho, Wo, O):
    """Largest legal output row-block: Ho % TH == 0, (TH % 8 == 0 or TH == Ho) so the
    (TH, Wo*O) output BlockSpec is valid, and the f32 accumulator stays <= 128 KiB
    (<= 32 of the 64 vregs) so it never spills."""
    budget = 128 * 1024
    for th in range(Ho, 0, -1):
        if Ho % th:
            continue
        if th % 8 != 0 and th != Ho:
            continue
        if th * Wo * O * 4 <= budget:
            return th
    return Ho  # degenerate shapes: single block per image (always a legal BlockSpec)


def quan_conv2d(x_nchw, weight, gamma, beta, *, stride=1, padding=1, abits=8, eps=1e-5):
    N, C, H, W = x_nchw.shape
    O, Cw, KH, KW = weight.shape
    assert Cw == C
    if stride != 1:
        # TODO(synk): strided row/column gather of the quantized block; the module
        # instance under test uses stride=1.
        raise NotImplementedError("Pallas QuanConv2d path implemented for stride=1")
    f32 = jnp.float32

    x = jnp.transpose(x_nchw, (0, 2, 3, 1)).astype(f32)            # NHWC

    # ---- BatchNorm2d, training-mode batch statistics (fresh module, first call) ----
    mean = jnp.mean(x, axis=(0, 1, 2))
    var = jnp.mean(jnp.square(x - mean), axis=(0, 1, 2))           # biased variance
    a = gamma.astype(f32) / jnp.sqrt(var + eps)                    # y = a*x + b
    b = beta.astype(f32) - mean * a
    # TODO(synk): BN running-mean/var and AveragedRangeTracker EMA buffer updates are
    # stateful training bookkeeping that does not affect this forward output; not modeled.

    # ---- activation quantizer range (q_level='L': global min/max of the BN output) ----
    # y = a*x + b is monotone per channel, so the global extrema of y follow bit-exactly
    # from the per-channel extrema of x (no extra HBM pass to materialize y).
    xmin = jnp.min(x, axis=(0, 1, 2))
    xmax = jnp.max(x, axis=(0, 1, 2))
    y_lo = jnp.where(a >= 0, a * xmin + b, a * xmax + b)
    y_hi = jnp.where(a >= 0, a * xmax + b, a * xmin + b)
    qmin = float(-(1 << (abits - 1)))                              # -128
    qmax = float((1 << (abits - 1)) - 1)                           #  127
    float_range = jnp.maximum(jnp.abs(jnp.min(y_lo)), jnp.abs(jnp.max(y_hi)))
    # Guard the degenerate all-zero-BN-output case (PyTorch would produce NaN here).
    float_range = jnp.where(float_range > 0, float_range, jnp.float32(1.0))
    scale = (min(abs(qmin), abs(qmax)) / float_range).astype(f32)  # scalar
    scale_smem = scale.reshape(1)

    # ---- weight binarization, hoisted out of the kernel (done once) ----
    # meancenter_clampConvParams uses out-of-place Tensor.sub()/.clamp() whose results
    # are discarded, so it is an identity on the weight -- reproduced as identity.
    wf = weight.astype(f32)
    alpha = jnp.mean(jnp.abs(wf), axis=(1, 2, 3))                  # (O,) per out-channel
    sgn = jnp.sign(wf)                                             # (O, C, KH, KW)

    # ---- geometry ----
    P = padding
    Hp, Wp = H + 2 * P, W + 2 * P
    Ho = (H + 2 * P - KH) // stride + 1
    Wo = (W + 2 * P - KW) // stride + 1
    L = Wp * C                                                     # lane-dense minor dim

    # Zero-padded, lane-flattened activation: (N, Hp, Wp*C).
    # TODO(synk): the pad is one extra HBM pass over x; could be folded into the kernel
    # by clamping the row window and extending the in-kernel mask.
    xp = jnp.pad(x, ((0, 0), (P, P), (P, P), (0, 0))).reshape(N, Hp, L)

    # BN scale/shift tiled to the (1, Wp*C) lane layout, with the *column* zero-padding
    # folded in statically (a = b = 0 on pad columns -> quantized code 0 for free).
    col_valid = ((jnp.arange(Wp) >= P) & (jnp.arange(Wp) < W + P))[:, None]    # (Wp, 1)
    a_l = jnp.where(col_valid, a[None, :], 0.0).reshape(1, L)
    b_l = jnp.where(col_valid, b[None, :], 0.0).reshape(1, L)

    # Block-Toeplitz conv RHS, one (Wp*C, Wo*O) matrix per kernel row kh:
    #   G[kh, w*C + c, ow*O + o] = sign(W)[o, c, kh, w - ow]  if 0 <= w - ow < KW else 0
    # so q_rows[kh] @ G[kh] contracts the whole (kw, c) extent in one fat dot and lands
    # directly in the packed (TH, Wo*O) output layout.  Built once in the wrapper.
    # (For large C this trades extra, otherwise-idle MXU K-columns for zero in-kernel
    #  relayouts; TODO(synk): switch to a per-tap K=KH*KW*C contraction when C >= ~32.)
    sgn_t = jnp.transpose(sgn, (2, 3, 1, 0))                       # (KH, KW, C, O)
    dw = jnp.arange(Wp)[None, :] - (jnp.arange(Wo) * stride)[:, None]        # (Wo, Wp)
    in_win = (dw >= 0) & (dw < KW)
    gd = sgn_t[:, jnp.clip(dw, 0, KW - 1), :, :]                   # (KH, Wo, Wp, C, O)
    gd = jnp.where(in_win[None, :, :, None, None], gd, 0.0)
    G = jnp.transpose(gd, (0, 2, 3, 1, 4)).reshape(KH, L, Wo * O).astype(jnp.bfloat16)

    # Per-(ow, o) post-scale alpha[o]/scale, tiled over ow to match the packed lanes.
    ps = jnp.tile(alpha / scale, Wo).reshape(1, Wo * O).astype(f32)

    # ---- row-block tiling & VMEM budget ----
    TH = _pick_block_rows(Ho, Wo, O)
    n_blocks = Ho // TH
    th_in = (TH - 1) * stride + KH                                 # input rows incl. halo

    try:   # raise the budget on v5e/v6e (128 MiB physical) while respecting v7x (64 MiB)
        vmem_cap = int(pltpu.get_tpu_info().vmem_capacity_bytes)
    except Exception:
        vmem_cap = 64 * 1024 * 1024
    vmem_limit = max(32 * 1024 * 1024, min(vmem_cap * 3 // 4, 100 * 1024 * 1024))

    kernel = functools.partial(_quanconv_kernel, H=H, P=P, KH=KH, TH=TH,
                               th_in=th_in, qmin=qmin, qmax=qmax)

    # The full padded image stays VMEM-resident per batch element (its block index is
    # constant across row-blocks, so it is DMA'd once per image and revisited).  With
    # the lane-dense layout that is the natural image size, not 128/C x it.
    # TODO(synk): for very large images on v7x, move the image to memory_space=pl.ANY
    # and manually DMA only the th_in-row halo window per grid step.
    out = pl.pallas_call(
        kernel,
        out_shape=jax.ShapeDtypeStruct((N, Ho, Wo * O), f32),
        grid=(N, n_blocks),
        in_specs=[
            pl.BlockSpec((None, Hp, L), lambda n, i: (n, 0, 0)),
            pl.BlockSpec((1, L), lambda n, i: (0, 0)),
            pl.BlockSpec((1, L), lambda n, i: (0, 0)),
            pl.BlockSpec(memory_space=pltpu.MemorySpace.SMEM),     # activation scale
            pl.BlockSpec((KH, L, Wo * O), lambda n, i: (0, 0, 0)),
            pl.BlockSpec((1, Wo * O), lambda n, i: (0, 0)),
        ],
        # Packed lane-dense output: no padding of O, exact HBM bytes, no wrapper slice.
        out_specs=pl.BlockSpec((None, TH, Wo * O), lambda n, i: (n, i, 0)),
        compiler_params=pltpu.CompilerParams(
            # batch axis "parallel" so v7x's two TensorCores take one image each (and do
            # not both re-DMA the same image); row-block axis "arbitrary".
            dimension_semantics=("parallel", "arbitrary"),
            vmem_limit_bytes=int(vmem_limit)),
    )(xp, a_l, b_l, scale_smem, G, ps)

    out = out.reshape(N, Ho, Wo, O)                                # free (contiguous)
    return jnp.transpose(out, (0, 3, 1, 2))                        # NCHW, matches PyTorch


def _reference_quan_conv2d(x_nchw, weight, gamma, beta, *, stride=1, padding=1,
                           abits=8, eps=1e-5):
    """Pure-JAX reference of the module forward (for a correctness sanity check)."""
    f32 = jnp.float32
    x = jnp.transpose(x_nchw, (0, 2, 3, 1)).astype(f32)            # NHWC
    mean = jnp.mean(x, axis=(0, 1, 2))
    var = jnp.mean(jnp.square(x - mean), axis=(0, 1, 2))
    a = gamma.astype(f32) / jnp.sqrt(var + eps)
    b = beta.astype(f32) - mean * a
    y = x * a + b
    qmin = float(-(1 << (abits - 1)))
    qmax = float((1 << (abits - 1)) - 1)
    float_range = jnp.maximum(jnp.abs(jnp.min(y)), jnp.abs(jnp.max(y)))
    s = min(abs(qmin), abs(qmax)) / float_range
    q = jnp.clip(jnp.round(y * s), qmin, qmax) / s
    alpha = jnp.mean(jnp.abs(weight), axis=(1, 2, 3)).reshape(-1, 1, 1, 1)
    wb = jnp.transpose(jnp.sign(weight) * alpha, (2, 3, 1, 0)).astype(f32)  # HWIO
    out = jax.lax.conv_general_dilated(
        q, wb, (stride, stride), ((padding, padding), (padding, padding)),
        dimension_numbers=("NHWC", "HWIO", "NHWC"))
    out = jnp.maximum(out, 0.0)
    return jnp.transpose(out, (0, 3, 1, 2))


if __name__ == "__main__":
    key = jax.random.PRNGKey(0)
    k1, k2, k3, k4 = jax.random.split(key, 4)
    # QuanConv2d(input_channels=4, output_channels=8, kernel_size=3, stride=1, padding=1)
    N, C, H, W = 2, 4, 16, 16
    O, KH = 8, 3
    x = jax.random.normal(k1, (N, C, H, W), jnp.float32)
    conv_weight = 0.1 * jax.random.normal(k2, (O, C, KH, KH), jnp.float32)   # Conv2d_Q.weight
    bn_gamma = 1.0 + 0.1 * jax.random.normal(k3, (C,), jnp.float32)          # BatchNorm2d.weight
    bn_beta = 0.1 * jax.random.normal(k4, (C,), jnp.float32)                 # BatchNorm2d.bias

    y = quan_conv2d(x, conv_weight, bn_gamma, bn_beta, stride=1, padding=1, abits=8)
    jax.block_until_ready(y)
    assert y.shape == (N, O, H, W)

    y_ref = _reference_quan_conv2d(x, conv_weight, bn_gamma, bn_beta,
                                   stride=1, padding=1, abits=8)
    max_err = float(jnp.max(jnp.abs(y - y_ref)))
    assert max_err < 1e-3, f"mismatch vs reference: {max_err}"
    print("KERNEL_OK")
</pallas_src>

<mosaic_0001>
module attributes {stable_mosaic.version = 11 : i64} {
  func.func @_quanconv_kernel(%arg0: i32, %arg1: i32, %arg2: memref<1x18x72xf32, #tpu.memory_space<vmem>>, %arg3: memref<1x72xf32, #tpu.memory_space<vmem>>, %arg4: memref<1x72xf32, #tpu.memory_space<vmem>>, %arg5: memref<1xf32, #tpu.memory_space<smem>>, %arg6: memref<3x72x128xbf16, #tpu.memory_space<vmem>>, %arg7: memref<1x128xf32, #tpu.memory_space<vmem>>, %arg8: memref<1x16x128xf32, #tpu.memory_space<vmem>>) attributes {dimension_semantics = [#tpu.dimension_semantics<parallel>, #tpu.dimension_semantics<arbitrary>], iteration_bounds = array<i64: 2, 1>, scalar_prefetch = 0 : i64, scratch_operands = 0 : i64, tpu.core_type = #tpu.core_type<tc>, window_params = [{transform_indices = @transform_0, window_bounds = array<i64: 1, 18, 72>}, {pipeline_mode = #tpu.pipeline_mode<synchronous>, transform_indices = @transform_1, window_bounds = array<i64: 1, 72>}, {pipeline_mode = #tpu.pipeline_mode<synchronous>, transform_indices = @transform_2, window_bounds = array<i64: 1, 72>}, {transform_indices = @transform_3, window_bounds = array<i64: 1>}, {pipeline_mode = #tpu.pipeline_mode<synchronous>, transform_indices = @transform_4, window_bounds = array<i64: 3, 72, 128>}, {pipeline_mode = #tpu.pipeline_mode<synchronous>, transform_indices = @transform_5, window_bounds = array<i64: 1, 128>}, {transform_indices = @transform_6, window_bounds = array<i64: 1, 16, 128>}]} {
    %c16_i32 = arith.constant 16 : i32
    %0 = arith.muli %arg1, %c16_i32 : i32
    %1 = tpu.assume_multiple %0, 16 : i32
    %c0 = arith.constant 0 : index
    %2 = arith.index_cast %1 : i32 to index
    %c0_0 = arith.constant 0 : index
    %3 = vector.load %arg2[%c0, %2, %c0_0] : memref<1x18x72xf32, #tpu.memory_space<vmem>>, vector<1x18x72xf32>
    %4 = vector.shape_cast %3 : vector<1x18x72xf32> to vector<18x72xf32>
    %c0_1 = arith.constant 0 : index
    %c0_2 = arith.constant 0 : index
    %5 = vector.load %arg3[%c0_1, %c0_2] : memref<1x72xf32, #tpu.memory_space<vmem>>, vector<1x72xf32>
    %6 = vector.broadcast %5 : vector<1x72xf32> to vector<18x72xf32>
    %7 = arith.mulf %4, %6 : vector<18x72xf32>
    %c0_3 = arith.constant 0 : index
    %c0_4 = arith.constant 0 : index
    %8 = vector.load %arg4[%c0_3, %c0_4] : memref<1x72xf32, #tpu.memory_space<vmem>>, vector<1x72xf32>
    %9 = vector.broadcast %8 : vector<1x72xf32> to vector<18x72xf32>
    %10 = arith.addf %7, %9 : vector<18x72xf32>
    %c0_5 = arith.constant 0 : index
    %11 = memref.load %arg5[%c0_5] : memref<1xf32, #tpu.memory_space<smem>>
    %12 = vector.broadcast %11 : f32 to vector<18x72xf32>
    %13 = arith.mulf %10, %12 : vector<18x72xf32>
    %14 = math.roundeven %13 : vector<18x72xf32>
    %cst = arith.constant -1.280000e+02 : f32
    %cst_6 = arith.constant 1.270000e+02 : f32
    %15 = vector.broadcast %cst : f32 to vector<18x72xf32>
    %16 = arith.maximumf %15, %14 : vector<18x72xf32>
    %17 = vector.broadcast %cst_6 : f32 to vector<18x72xf32>
    %18 = arith.minimumf %17, %16 : vector<18x72xf32>
    %19 = tpu.iota {dimensions = array<i32: 0>} : vector<18x1xi32>
    %20 = vector.broadcast %1 : i32 to vector<18x1xi32>
    %21 = arith.addi %19, %20 : vector<18x1xi32>
    %c1_i32 = arith.constant 1 : i32
    %22 = vector.broadcast %c1_i32 : i32 to vector<18x1xi32>
    %23 = arith.cmpi sge, %21, %22 : vector<18x1xi32>
    %c17_i32 = arith.constant 17 : i32
    %24 = vector.broadcast %c17_i32 : i32 to vector<18x1xi32>
    %25 = arith.cmpi slt, %21, %24 : vector<18x1xi32>
    %26 = arith.andi %23, %25 : vector<18x1xi1>
    %cst_7 = arith.constant 0.000000e+00 : f32
    %27 = vector.shape_cast %26 : vector<18x1xi1> to vector<18x1xi1>
    %28 = vector.broadcast %27 : vector<18x1xi1> to vector<18x72xi1>
    %29 = vector.broadcast %cst_7 : f32 to vector<18x72xf32>
    %30 = arith.select %28, %18, %29 : vector<18x72xi1>, vector<18x72xf32>
    %31 = arith.truncf %30 : vector<18x72xf32> to vector<18x72xbf16>
    %32 = vector.extract_strided_slice %31 {offsets = [0, 0], sizes = [16, 72], strides = [1, 1]} : vector<18x72xbf16> to vector<16x72xbf16>
    %c0_8 = arith.constant 0 : index
    %c0_9 = arith.constant 0 : index
    %c0_10 = arith.constant 0 : index
    %33 = vector.load %arg6[%c0_8, %c0_9, %c0_10] : memref<3x72x128xbf16, #tpu.memory_space<vmem>>, vector<1x72x128xbf16>
    %34 = vector.shape_cast %33 : vector<1x72x128xbf16> to vector<72x128xbf16>
    %cst_11 = arith.constant dense<0.000000e+00> : vector<16x128xf32>
    %35 = tpu.matmul %32, %34, %cst_11 {dimension_numbers = #tpu.dot_dimension_numbers<[1], [0], [0], [1], [0, 0, 1, 1], [], []>} : vector<16x72xbf16>, vector<72x128xbf16>, vector<16x128xf32> -> vector<16x128xf32>
    %36 = vector.extract_strided_slice %31 {offsets = [1, 0], sizes = [16, 72], strides = [1, 1]} : vector<18x72xbf16> to vector<16x72xbf16>
    %c1 = arith.constant 1 : index
    %c0_12 = arith.constant 0 : index
    %c0_13 = arith.constant 0 : index
    %37 = vector.load %arg6[%c1, %c0_12, %c0_13] : memref<3x72x128xbf16, #tpu.memory_space<vmem>>, vector<1x72x128xbf16>
    %38 = vector.shape_cast %37 : vector<1x72x128xbf16> to vector<72x128xbf16>
    %cst_14 = arith.constant dense<0.000000e+00> : vector<16x128xf32>
    %39 = tpu.matmul %36, %38, %cst_14 {dimension_numbers = #tpu.dot_dimension_numbers<[1], [0], [0], [1], [0, 0, 1, 1], [], []>} : vector<16x72xbf16>, vector<72x128xbf16>, vector<16x128xf32> -> vector<16x128xf32>
    %40 = arith.addf %35, %39 : vector<16x128xf32>
    %41 = vector.extract_strided_slice %31 {offsets = [2, 0], sizes = [16, 72], strides = [1, 1]} : vector<18x72xbf16> to vector<16x72xbf16>
    %c2 = arith.constant 2 : index
    %c0_15 = arith.constant 0 : index
    %c0_16 = arith.constant 0 : index
    %42 = vector.load %arg6[%c2, %c0_15, %c0_16] : memref<3x72x128xbf16, #tpu.memory_space<vmem>>, vector<1x72x128xbf16>
    %43 = vector.shape_cast %42 : vector<1x72x128xbf16> to vector<72x128xbf16>
    %cst_17 = arith.constant dense<0.000000e+00> : vector<16x128xf32>
    %44 = tpu.matmul %41, %43, %cst_17 {dimension_numbers = #tpu.dot_dimension_numbers<[1], [0], [0], [1], [0, 0, 1, 1], [], []>} : vector<16x72xbf16>, vector<72x128xbf16>, vector<16x128xf32> -> vector<16x128xf32>
    %45 = arith.addf %40, %44 : vector<16x128xf32>
    %c0_18 = arith.constant 0 : index
    %c0_19 = arith.constant 0 : index
    %46 = vector.load %arg7[%c0_18, %c0_19] : memref<1x128xf32, #tpu.memory_space<vmem>>, vector<1x128xf32>
    %47 = vector.broadcast %46 : vector<1x128xf32> to vector<16x128xf32>
    %48 = arith.mulf %45, %47 : vector<16x128xf32>
    %cst_20 = arith.constant 0.000000e+00 : f32
    %49 = vector.broadcast %cst_20 : f32 to vector<16x128xf32>
    %50 = arith.maximumf %48, %49 : vector<16x128xf32>
    %c0_21 = arith.constant 0 : index
    %c0_22 = arith.constant 0 : index
    %c0_23 = arith.constant 0 : index
    %51 = vector.load %arg8[%c0_21, %c0_22, %c0_23] : memref<1x16x128xf32, #tpu.memory_space<vmem>>, vector<1x16x128xf32>
    %52 = vector.shape_cast %51 : vector<1x16x128xf32> to vector<16x128xf32>
    %53 = vector.shape_cast %50 : vector<16x128xf32> to vector<1x16x128xf32>
    tpu.vector_store %arg8[%c0_21, %c0_22, %c0_23], %53 {strides = array<i32>} : memref<1x16x128xf32, #tpu.memory_space<vmem>>, vector<1x16x128xf32>,
    return
  }
  func.func @transform_0(%arg0: i32, %arg1: i32) -> (i32, i32, i32) {
    %c0_i32 = arith.constant 0 : i32
    %c0_i32_0 = arith.constant 0 : i32
    %c0_i32_1 = arith.constant 0 : i32
    return %arg0, %c0_i32, %c0_i32_0 : i32, i32, i32
  }
  func.func @transform_1(%arg0: i32, %arg1: i32) -> (i32, i32) {
    %c0_i32 = arith.constant 0 : i32
    %c0_i32_0 = arith.constant 0 : i32
    %c0_i32_1 = arith.constant 0 : i32
    return %c0_i32, %c0_i32_0 : i32, i32
  }
  func.func @transform_2(%arg0: i32, %arg1: i32) -> (i32, i32) {
    %c0_i32 = arith.constant 0 : i32
    %c0_i32_0 = arith.constant 0 : i32
    %c0_i32_1 = arith.constant 0 : i32
    return %c0_i32, %c0_i32_0 : i32, i32
  }
  func.func @transform_3(%arg0: i32, %arg1: i32) -> i32 {
    %c0_i32 = arith.constant 0 : i32
    %c0_i32_0 = arith.constant 0 : i32
    return %c0_i32 : i32
  }
  func.func @transform_4(%arg0: i32, %arg1: i32) -> (i32, i32, i32) {
    %c0_i32 = arith.constant 0 : i32
    %c0_i32_0 = arith.constant 0 : i32
    %c0_i32_1 = arith.constant 0 : i32
    %c0_i32_2 = arith.constant 0 : i32
    return %c0_i32, %c0_i32_0, %c0_i32_1 : i32, i32, i32
  }
  func.func @transform_5(%arg0: i32, %arg1: i32) -> (i32, i32) {
    %c0_i32 = arith.constant 0 : i32
    %c0_i32_0 = arith.constant 0 : i32
    %c0_i32_1 = arith.constant 0 : i32
    return %c0_i32, %c0_i32_0 : i32, i32
  }
  func.func @transform_6(%arg0: i32, %arg1: i32) -> (i32, i32, i32) {
    %c0_i32 = arith.constant 0 : i32
    %c0_i32_0 = arith.constant 0 : i32
    return %arg0, %arg1, %c0_i32 : i32, i32, i32
  }
}

</mosaic_0001>

<bundles_post_ra>
// kernel: tpu_custom_call.1
= control target key start
LH: loop header
LB: loop body
LE: loop exit
PB: predicated region body
PF: predicated region fallthrough
CT: control target
= control target key end

     0   :  { %s1283_s0 = inlined_call_operand.vmem [shape: f32[2,18,72], index: 0, kind: input, shape index: {}]   ;;  %s1284_s1 = inlined_call_operand.vmem [shape: f32[1,72], index: 1, kind: input, shape index: {}]   ;;  %s1285_s2 = inlined_call_operand.vmem [shape: f32[1,72], index: 2, kind: input, shape index: {}]   ;;  %s1286_s3 = inlined_call_operand.<no memory space> [shape: f32[1], index: 3, kind: input, shape index: {}]   ;;  %s1287_s4 = inlined_call_operand.hbm [shape: bf16[3,72,128], index: 4, kind: input, shape index: {}]   ;;  %s1288_s5 = inlined_call_operand.vmem [shape: f32[1,128], index: 5, kind: input, shape index: {}]   ;;  %s1289_s6 = inlined_call_operand.hbm [shape: f32[2,16,128], index: 6, kind: output, shape index: {}]  }
   0x1   :  { %11 = sst [smem:[#allocation2]] %s1286_s3 }
   0x2   :  { %12 = vsyncpa [#allocation4], 0 }
   0x3   :  { %13 = vsyncpa [#allocation5], 0 }
   0x4   :  { %15 = vsyncpa [#allocation5 + $0x1], 0  ;;  %s1089_s23 = smov 0   ;;  %s1091_s24 = smov 0  }
   0x5   :  { %s1093_s25 = smov 0   ;;  %s1095_s26 = smov 0  }
   0x6   :  { %s1097_s27 = smov 0   ;;  %s1099_s28 = smov 0  }
   0x7 LB: > { %s738_s3 = sadd.s32 4294967295, %s1041_s28   ;;  %s739_s29 = sadd.s32 4294967294, %s1041_s28   ;;  %s1041_s28 = sphi %s1099_s28, %s21_s28   ;;  %s1037_s27 = sphi %s1097_s27, %s1307_s27   ;;  %s1033_s26 = sphi %s1095_s26, %s1306_s26   ;;  %s1029_s25 = sphi %s1093_s25, %s1305_s25   ;;  %s1025_s24 = sphi %s1091_s24, %s1304_s24   ;;  %s1021_s23 = sphi %s1089_s23, %s1303_s23  }
   0x8   : > { %s33_s30 = sadd.s32 1, %s1037_s27  ;;  %s173_s7 = sadd.s32 1, %s1029_s25 }
   0x9   : > { %p35_p0 = scmp.ge.s32.totalorder %s33_s30, 2  ;;  %p183_p1 = scmp.ne.s32.totalorder %s1029_s25, %s1025_s24 }
   0xa   : > { %p184_p2 = scmp.eq.s32.totalorder %s738_s3, 1  ;;  %p189_p3 = scmp.ne.s32.totalorder %s1025_s24, %s1021_s23 }
   0xb   : > { %s1309_s30 = smov (%p35_p0, %s33_s30), 0  ;;  %p190_p5 = scmp.eq.s32.totalorder %s739_s29, 1 }
   0xc   : > { %p1129_p4 = por %p184_p2, %p183_p1  ;;  %s168_s9 = ssub.s32 %s1037_s27, %s1309_s30 }
   0xd   : > { %p740_p6 = scmp.ge.s32.totalorder %s1041_s28, 1  ;;  %p171_p7 = scmp.eq.s32.totalorder %s168_s9, 0 }
   0xe   : > { %s1294_s8 = scalar_select %p1129_p4, 1, 0 }
   0xf   : > { %p1136_p8 = por %p190_p5, %p189_p3  ;;  %p197_p9 = scmp.lt.s32.totalorder %s1041_s28, 3 }
  0x10   : > { %s1142_s11 = scalar_select %p171_p7, %s1029_s25, %s173_s7  }
  0x11   : > { %s1295_s10 = scalar_select %p1136_p8, 1, 0 }
  0x12   : > { %p1144_p10 = pnand %p740_p6, %p197_p9  ;;  %p1148_p11 = scmp.eq.s32.totalorder %s738_s3, 0 }
  0x13   : > { %s1043_s14 = smov [#allocation3]   ;;  %s931_s19 = scalar_lea.hbm %s1287_s4, 1728 }
  0x14   : > { %s1296_s12 = scalar_select %p1144_p10, 1, 0 }
  0x15   : > { %s1297_s13 = scalar_select %p1148_p11, 1, 0 }
  0x16   : > { %p850_p12 = pneg %p1144_p10  ;;  %s218_s15 = sshll.u32 %s1043_s14, 4  ;;  %s219_s15 = int_to_ptr.vmem [resolvable:$true] %s218_s15 }
  0x17   : > { %p932_p0 = scmp.ne.s32.totalorder %s1287_s4, %s931_s19  ;;  %p938_p5 = scmp.lt.u32.totalorder %s931_s19, %s1287_s4 }
  0x18   : > { %p1156_p13 = pnand %p1148_p11, %p850_p12 }
  0x1a   : > { %p933_p1 = pneg %p1156_p13 }
  0x1c   : > { %p934_p2 = pnand %p933_p1, %p932_p0 }
  0x1e   : > { %p935_p3 = pneg %p934_p2 }
  0x20   : > { %p940_p6 = pnand %p938_p5, %p935_p3 }
  0x22   : > { %943 = shalt.err (!%p940_p6)
}
  0x23   : > { %s944_s29 = scalar_lea.vmem %s219_s15, 1728  ;;  %p952_p8 = scmp.lt.s32.totalorder %s219_s15, %s219_s15 }
  0x24   : > { %p945_p7 = scmp.ne.s32.totalorder %s219_s15, %s944_s29  ;;  %p953_p4 = scmp.lt.s32.totalorder %s944_s29, %s944_s29 }
  0x26   : > { %p947_p9 = pnand %p945_p7, %p933_p1  ;;  %p954_p11 = por %p953_p4, %p952_p8 }
  0x28   : > { %p948_p12 = pneg %p947_p9 }
  0x2a   : > { %p955_p10 = pnand %p954_p11, %p948_p12 }
  0x2c   : > { %958 = shalt.err (!%p955_p10)
}
  0x2d   : > { %s1044_s7 = smov 64   ;;  %s1045_s9 = smov 4  }
  0x2e   : > { %853 = dma.hbm_to_vmem [thread:$0]  (!%p1156_p13), %s1287_s4, 1728, %s219_s15, [#allocation4], %s1044_s7, %s1044_s7, %s1045_s9  }
  0x2f   : > { %p1299_p0 = scmp.ne.s32.totalorder %s1296_s12, 0 }
  0x30   : > { %p1300_p2 = scmp.ne.s32.totalorder (!%p1299_p0), %s1297_s13, 0 }
  0x31   : > { %245 = sbr.rel (%p1299_p0) target bundleno = 335 (0x14f), region = 44 }
  0x38   : > { %1012 = dma.done.wait (%p1300_p2), [#allocation4], 1728  }
  0x39   : > { %1014 = vsyncadd (%p1300_p2), [#allocation4], 4294965568  ;;  %p275_p4 = scmp.lt.s32.totalorder %s1033_s26, 1  ;;  %v1046_v0 = vmov 0.0   ;;  %vm1047_vm0 = vmmov 0   ;;  %s307_s16 = sld [smem:[#allocation2]]  ;;  %v321_v12 = vlaneseq }
  0x3a   : > { %806 = vmatprep.subr.bf16.mxu0 %v1046_v0  ;;  %792 = vmatprep.subr.bf16.mxu1 %v1046_v0  ;;  %v916_v1 = vld [vmem:[#allocation3] sm:$0xff]   ;;  %v917_v2 = vld [vmem:[#allocation3 + $0x8] sm:$0xff]   ;;  %v918_v3 = vld [vmem:[#allocation3 + $0x10] sm:$0xff]   ;;  %vm412_vm1 = vcmask 1043456   ;;  %vm408_vm3 = vcmask 588800   ;;  %vm542_vm6 = vcmask 1046528  }
  0x3b   : > { %816 = vmatprep.mubr.msk.bf16.mxu0 %vm1047_vm0, %v1046_v0  ;;  %s276_s12 = scalar_select %p275_p4, %s1033_s26, 1  ;;  %802 = vmatprep.mubr.msk.bf16.mxu1 %vm1047_vm0, %v1046_v0  ;;  %v921_v4 = vld [vmem:[#allocation3 + $0x24] sm:$0xff]   ;;  %v747_v7 = vld [vmem:[%s1284_s1] ss:$0 sm:$0xff]  ;;  %v923_v13 = vld [vmem:[#allocation3 + $0x2c] sm:$0xff]   ;;  %v322_v21 = vshrl.u32 %v321_v12, 7 }
  0x3c   : > { %807 = vmatpush3.bf16.msra.mxu0 %v916_v1  ;;  %v748_v8 = vld [vmem:[%s1285_s2] ss:$0 sm:$0xff]  ;;  %793 = vmatpush3.bf16.msra.mxu1 %v921_v4  ;;  %v919_v14 = vld [vmem:[#allocation3 + $0x18] sm:$0xff]   ;;  %v929_v30 = vld [vmem:[#allocation3 + $0x44] ss:$0 sps:$4 sm:$0xff]   ;;  %s272_s29 = sand.u32 1, %s1025_s24  }
  0x3d   : > { %s840_s15 = smul.u32 24, %s276_s12  ;;  %808 = vmatprep.subr.bf16.mxu0 %v1046_v0  ;;  %794 = vmatprep.subr.bf16.mxu1 %v1046_v0  ;;  %v920_v17 = vld [vmem:[#allocation3 + $0x20] ss:$0 sps:$4 sm:$0xff]   ;;  %v925_v20 = vld [vmem:[#allocation3 + $0x34] sm:$0xff]   ;;  %vm329_vm2 = vcmp.ge.s32.totalorder %v322_v21, 1  ;;  %v922_v35 = vld [vmem:[#allocation3 + $0x48] sm:$0xff]  }
  0x3e   : > { %v487_v25 = vsel %vm412_vm1, %v920_v17, 0  ;;  %v927_v28 = vld [vmem:[#allocation3 + $0x3c] sm:$0xff]   ;;  %v414_v38 = vsel %vm412_vm1, %v929_v30, 0  ;;  %v324_v39 = vadd.s32 16, %v322_v21  ;;  %v924_v42 = vld [vmem:[#allocation3 + $0x50] sm:$0xff]   ;;  %s745_s7 = sshll.u32 %s272_s29, 4 }
  0x3f   : > { %s1193_s19 = scalar_lea.vmem %s1283_s0, %s840_s15  ;;  %v308_v11 = vstv %s307_s16  ;;  %v926_v47 = vld [vmem:[#allocation3 + $0x58] sm:$0xff]   ;;  %v928_v52 = vld [vmem:[#allocation3 + $0x60] sm:$0xff]   ;;  %vm368_vm5 = vsmask.f32 7424  ;;  %v930_v54 = vld [vmem:[#allocation3 + $0x68] ss:$0 sps:$4 sm:$0xff]  }
  0x40   : > { %v284_v5 = vld [vmem:[%s1193_s19] sm:$0xff]  ;;  %809 = vmatpush3.bf16.msra.mxu0 %v917_v2  ;;  %v285_v6 = vld [vmem:[%s1193_s19 + $0x8] sm:$0xff]  ;;  %795 = vmatpush3.bf16.msra.mxu1 %v923_v13  ;;  %v286_v24 = vld [vmem:[%s1193_s19 + $0x10] sm:$0x3]  ;;  %vm334_vm4 = vcmp.lt.s32.totalorder %v324_v39, 17  ;;  %v577_v58 = vsel %vm412_vm1, %v930_v54, 0 }
  0x41   : > { %810 = vmatprep.subr.bf16.mxu0 %v1046_v0  ;;  %v294_v9 = vmul.f32 %v747_v7, %v284_v5  ;;  %v295_v10 = vmul.f32 %v747_v7, %v285_v6  ;;  %796 = vmatprep.subr.bf16.mxu1 %v1046_v0  ;;  %v296_v29 = vmul.f32 %v747_v7, %v286_v24  ;;  %v767_v2 = vld [vmem:[%s1288_s5] ss:$0 sm:$0xff]  ;;  %s274_s17 = scalar_lea.vmem [#allocation6], %s745_s7  ;;  %s773_s15 = sshll.u32 %s1033_s26, 8 }
  0x42   : > { %s651_s12 = sshll.u32 %s274_s17, 4  ;;  %s1235_s18 = scalar_lea.hbm %s1289_s6, %s773_s15  ;;  %s1230_s12 = int_to_ptr.vmem [resolvable:$true] %s651_s12 }
  0x43   : > { %v304_v15 = vadd.f32 %v748_v8, %v294_v9  ;;  %v305_v16 = vadd.f32 %v748_v8, %v295_v10  ;;  %v306_v33 = vadd.f32 %v748_v8, %v296_v29  ;;  %s1237_s19 = scalar_lea.sflag [#allocation5], %s272_s29  ;;  %s959_s20 = scalar_lea.vmem %s1230_s12, 256 }
  0x44   : > { %811 = vmatpush3.bf16.msra.mxu0 %v918_v3  ;;  %797 = vmatpush3.bf16.msra.mxu1 %v925_v20  ;;  %p960_p8 = scmp.ne.s32.totalorder %s1230_s12, %s959_s20  ;;  %p1301_p10 = scmp.ne.s32.totalorder %s1294_s8, 0 }
  0x45   : > { %812 = vmatprep.subr.bf16.mxu0 %v1046_v0  ;;  %v309_v18 = vmul.f32 %v308_v11, %v304_v15  ;;  %v310_v19 = vmul.f32 %v308_v11, %v305_v16  ;;  %798 = vmatprep.subr.bf16.mxu1 %v1046_v0  ;;  %v311_v36 = vmul.f32 %v308_v11, %v306_v33  ;;  %s1048_s26 = smov [#allocation6]  }
  0x46   : > { %p961_p11 = pnand %p960_p8, %p1301_p10  ;;  %s963_s21 = sshll.u32 %s1048_s26, 4  ;;  %s964_s21 = int_to_ptr.vmem [resolvable:$false] %s963_s21 }
  0x47   : > { %v841_v22 = vround.rtne.f32 %v309_v18  ;;  %v842_v23 = vround.rtne.f32 %v310_v19  ;;  %v843_v40 = vround.rtne.f32 %v311_v36  ;;  %s965_s22 = scalar_lea.vmem %s964_s21, 512  ;;  %p966_p1 = scmp.lt.s32.totalorder %s1230_s12, %s964_s21 }
  0x48   : > { %813 = vmatpush3.bf16.msra.mxu0 %v919_v14  ;;  %799 = vmatpush3.bf16.msra.mxu1 %v927_v28  ;;  %p962_p13 = pneg %p961_p11  ;;  %p967_p3 = scmp.lt.s32.totalorder %s965_s22, %s959_s20 }
  0x49   : > { %814 = vmatprep.subr.bf16.mxu0 %v1046_v0  ;;  %v315_v26 = vmax.f32 %v841_v22, -128.0  ;;  %v316_v27 = vmax.f32 %v842_v23, -128.0  ;;  %800 = vmatprep.subr.bf16.mxu1 %v1046_v0  ;;  %v317_v43 = vmax.f32 %v843_v40, -128.0 }
  0x4a   : > { %p968_p5 = por %p967_p3, %p966_p1 }
  0x4b   : > { %v318_v31 = vmin.f32 %v315_v26, 127.0  ;;  %v319_v32 = vmin.f32 %v316_v27, 127.0  ;;  %v320_v44 = vmin.f32 %v317_v43, 127.0 }
  0x4c   : > { %815 = vmatpush3.bf16.msra.mxu0 %v487_v25  ;;  %801 = vmatpush3.bf16.msra.mxu1 %v414_v38  ;;  %p969_p6 = pnand %p968_p5, %p962_p13 }
  0x4d   : > { %820 = vmatprep.subr.bf16.mxu0 %v1046_v0  ;;  %v344_v34 = vsel %vm329_vm2, %v318_v31, 0.0  ;;  %v346_v48 = vsel %vm334_vm4, %v320_v44, 0.0 }
  0x4e   : > { %v347_v37 = vpack.c.bf16 %v319_v32, %v344_v34  ;;  %v348_v49 = vpack.c.bf16 %v346_v48, %v346_v48 }
  0x50   : > { %817 = vmatmul.mubr.msk.bf16.vlgmr.msra.gmra.mrb[0].mxu0 %vm408_vm3, %v347_v37  ;;  %v372_v41 = vshll.u32 %v347_v37, 16  ;;  %v370_v45 = vshrl.u32 %v347_v37, 16  ;;  %v377_v51 = vshll.u32 %v348_v49, 16  ;;  %v543_v56 = vrot.slane %v347_v37, 1 }
  0x51   : > { %821 = vmatpush3.bf16.msra.mxu0 %v922_v35  ;;  %830 = vmatprep.mubr.msk.bf16.mxu0 %vm1047_vm0, %v1046_v0  ;;  %v544_v57 = vrot.slane %v348_v49, 1 }
  0x52   : > { %822 = vmatprep.subr.bf16.mxu0 %v1046_v0  ;;  %v374_v46 = vrot.slane %v372_v41, 1  ;;  %v379_v53 = vrot.slane %v377_v51, 1 }
  0x53   : > { %v545_v59 = vsel %vm542_vm6, %v543_v56, %v544_v57 }
  0x54   : > { %v375_v50 = vor.u32 %v374_v46, %v370_v45 }
  0x55   : > { %823 = vmatpush3.bf16.msra.mxu0 %v924_v42 }
  0x56   : > { %824 = vmatprep.subr.bf16.mxu0 %v1046_v0  ;;  %v380_v55 = vsel %vm368_vm5, %v375_v50, %v379_v53 }
  0x57   : > { %803 = vmatmul.mubr.msk.bf16.vlgmr.msra.gmra.mrb[0].mxu1 %vm408_vm3, %v380_v55 }
  0x59   : > { %825 = vmatpush3.bf16.msra.mxu0 %v926_v47 }
  0x5a   : > { %826 = vmatprep.subr.bf16.mxu0 %v1046_v0 }
  0x5d   : > { %827 = vmatpush3.bf16.msra.mxu0 %v928_v52 }
  0x5e   : > { %828 = vmatprep.subr.bf16.mxu0 %v1046_v0 }
  0x61   : > { %829 = vmatpush3.bf16.msra.mxu0 %v577_v58 }
  0x64   : > { %831 = vmatmul.mubr.msk.bf16.vlgmr.msra.gmra.mrb[0].mxu0 %vm408_vm3, %v545_v59 }
 0x12a   : > { %v450_v60 = vpop.f32.mrb[0].mxu1 }
 0x12b   : > { %v804_v61 = vpop.f32.mrb[1].mxu1 }
 0x12c   : > { %v453_v62 = vpop.f32.mrb[2].mxu1 }
 0x12d   : > { %v805_v63 = vpop.f32.mrb[3].mxu1 }
 0x137   : > { %v613_v1 = vpop.f32.mrb[0].mxu0 }
 0x138   : > { %v834_v0 = vadd.f32 %v613_v1, %v450_v60  ;;  %v832_v3 = vpop.f32.mrb[1].mxu0 }
 0x139   : > { %v616_v4 = vpop.f32.mrb[2].mxu0 }
 0x13a   : > { %v629_v5 = vmul.f32 %v834_v0, %v767_v2  ;;  %v835_v6 = vadd.f32 %v616_v4, %v453_v62  ;;  %v833_v7 = vpop.f32.mrb[3].mxu0 }
 0x13c   : > { %v631_v8 = vmax.f32 %v629_v5, 0.0  ;;  %v630_v9 = vmul.f32 %v835_v6, %v767_v2 }
 0x13e   : > { %633 = vst [vmem:[%s274_s17] sm:$0xff] %v631_v8  ;;  %v632_v10 = vmax.f32 %v630_v9, 0.0 }
 0x140   : > { %634 = vst [vmem:[%s274_s17 + $0x8] sm:$0xff] %v632_v10 }
 0x141   : > { %972 = shalt.err (!%p969_p6)
}
 0x142   : > { %s973_s3 = scalar_lea.hbm %s1235_s18, 256  ;;  %s977_s9 = scalar_lea.hbm %s1289_s6, 512 }
 0x143   : > { %p974_p7 = scmp.ne.s32.totalorder %s1235_s18, %s973_s3  ;;  %p978_p0 = scmp.lt.u32.totalorder %s1235_s18, %s1289_s6 }
 0x144   : > { %p979_p2 = scmp.lt.u32.totalorder %s977_s9, %s973_s3  ;;  %p981_p8 = scmp.lt.u32.totalorder %s973_s3, %s1235_s18 }
 0x145   : > { %p975_p9 = pnand %p974_p7, %p1301_p10 }
 0x146   : > { %p980_p4 = por %p979_p2, %p978_p0 }
 0x147   : > { %p976_p12 = pneg %p975_p9 }
 0x148   : > { %p982_p11 = por %p981_p8, %p980_p4 }
 0x14a   : > { %p983_p13 = pnand %p982_p11, %p976_p12 }
 0x14c   : > { %986 = shalt.err (!%p983_p13)
}
 0x14d   : > { %s1049_s15 = smov 128   ;;  %s1050_s16 = smov 8  }
 0x14e   : > { %848 = dma.vmem_to_hbm [thread:$0]  (%p1301_p10), %s1230_s12, 256, %s1235_s18, %s1237_s19, %s1049_s15, %s1049_s15, %s1050_s16  }
 0x14f PF: > { %p860_p1 = scmp.ge.s32.totalorder %s1041_s28, 2  ;;  %s666_s13 = sand.u32 1, %s1021_s23  }
 0x150   : > { %p1302_p3 = scmp.ne.s32.totalorder %s1295_s10, 0  ;;  %s667_s20 = scalar_lea.sflag [#allocation5], %s666_s13 }
 0x152   : > { %p855_p5 = pnand %p860_p1, %p1302_p3 }
 0x154   : > { %1016 = dma.done.wait (!%p855_p5), %s667_s20, 256  }
 0x155   : > { %1018 = vsyncadd (!%p855_p5), %s667_s20, 4294967040  ;;  %s21_s28 = sadd.s32 1, %s1041_s28   ;;  %s1303_s23 = smov %s1025_s24 }
 0x156   : > { %p18_p6 = scmp.ge.s32.totalorder %s21_s28, 4   ;;  %s1304_s24 = smov %s1029_s25 }
 0x157   : > { %s1305_s25 = smov %s1142_s11  ;;  %s1306_s26 = smov %s1037_s27 }
 0x158   : > { %s1307_s27 = smov %s1309_s30  ;;  %20 = sbr.rel (!%p18_p6) target bundleno = 7 (0x7), region = 87 }
 0x15f   :  { %672 = vsyncpa [#allocation4], 1 }
 0x160   :  { %674 = vsyncpa [#allocation4 + $0x1], 1 }
 0x161   :  { %675 = vsyncpa [#allocation5], 1 }
 0x162   :  { %677 = vsyncpa [#allocation5 + $0x1], 1 }

</bundles_post_ra>
